<compile_context>
chip_gen: v7x
topology: tpu7x:2x2x1
jax: 0.10.0
libtpu: 0.0.40
codegen_flags: <defaults>
</compile_context>

<pallas_src>
import functools

import jax
import jax.numpy as jnp
from jax import lax
from jax.experimental import pallas as pl
from jax.experimental.pallas import tpu as pltpu


def _round_up(x, m):
    return (x + m - 1) // m * m


def _policy_mean_kernel(x_ref, w1t_ref, b1t_ref, w2t_ref, b2t_ref, mean_t_ref,
                        *, matmul_dtype):
    # x_ref:    [TB, obs_dim]  streamed straight from HBM (auto double-buffer)
    # w1t_ref:  [hidden, obs_dim]   (matmul dtype, VMEM-resident: const index)
    # b1t_ref:  [hidden, 1] f32
    # w2t_ref:  [act_dim, hidden]   (matmul dtype, VMEM-resident)
    # b2t_ref:  [act_dim, 1] f32
    # mean_t_ref: [act_dim, TB] -> batch on the 128-lane axis (unmasked stores)
    x = x_ref[...].astype(matmul_dtype)      # in-VMEM (VPU) downcast if bf16

    # h_t = tanh(W1^T @ x^T + b1)  -> [hidden, TB]; the transpose of the x tile
    # is folded into the contraction (both operands contract their dim 1).
    h = jnp.tanh(
        lax.dot_general(
            w1t_ref[...], x,
            dimension_numbers=(((1,), (1,)), ((), ())),
            preferred_element_type=jnp.float32,
        )
        + b1t_ref[...]
    )

    # Keep layer 2 on the same (possibly bf16) MXU path, f32 accumulation.
    h = h.astype(matmul_dtype)
    mean_t = (
        jnp.dot(w2t_ref[...], h, preferred_element_type=jnp.float32)
        + b2t_ref[...]
    )
    mean_t_ref[...] = mean_t.astype(mean_t_ref.dtype)


def policy_forward(state, w1, b1, w2, b2, log_std, *, block_b=16384,
                   matmul_dtype=jnp.float32, feature_major_output=False):
    """Pallas forward pass of the Gaussian policy head.

    Returns:
      mean: [B, act_dim] f32 (or [act_dim, B] if feature_major_output=True)
      std:  [1, act_dim] f32, broadcastable against mean (state-independent).

    state:   [B, obs_dim]
    w1:      [obs_dim, hidden]   b1: [hidden]
    w2:      [hidden, act_dim]   b2: [act_dim]
    log_std: [act_dim]
    """
    B, obs_dim = state.shape
    hidden = w1.shape[1]
    act_dim = w2.shape[1]
    assert w1.shape == (obs_dim, hidden)
    assert b1.shape == (hidden,)
    assert w2.shape == (hidden, act_dim)
    assert b2.shape == (act_dim,)
    assert log_std.shape == (act_dim,)

    # ---------------- batch-tile selection ----------------
    TB = _round_up(min(block_b, B), 128)          # TB is the lane dim of the out block
    if B >= 256:
        # >=2 grid steps so the "parallel" batch axis can shard across both
        # v7x TensorCores (negligible extra overhead on single-TC v5e/v6e).
        TB = min(TB, _round_up(pl.cdiv(B, 2), 128))

    def _tile_bytes(tb):
        in_b = 2 * tb * obs_dim * state.dtype.itemsize   # x tile, 2 buffers
        h_b = tb * hidden * 4                             # f32 tanh temporary
        out_b = 2 * act_dim * tb * 4                      # mean tile, 2 buffers
        return in_b + h_b + out_b

    VMEM_TILE_BUDGET = 36 << 20       # leaves headroom inside v7x's 64 MiB VMEM
    while TB > 128 and _tile_bytes(TB) > VMEM_TILE_BUDGET:
        TB = max(128, _round_up(TB // 2, 128))

    grid = (pl.cdiv(B, TB),)

    # One-time, tiny parameter prep (a few KB; not the streamed operand).
    w1t = w1.astype(matmul_dtype).T                      # [hidden, obs_dim]
    w2t = w2.astype(matmul_dtype).T                      # [act_dim, hidden]
    b1t = b1.reshape(hidden, 1).astype(jnp.float32)      # [hidden, 1]
    b2t = b2.reshape(act_dim, 1).astype(jnp.float32)     # [act_dim, 1]

    kernel = functools.partial(_policy_mean_kernel, matmul_dtype=matmul_dtype)

    mean_t = pl.pallas_call(
        kernel,
        out_shape=jax.ShapeDtypeStruct((act_dim, B), jnp.float32),
        grid=grid,
        in_specs=[
            # state streams over the batch grid, untransposed, no wrapper copy.
            pl.BlockSpec((TB, obs_dim), lambda i: (i, 0)),
            # weights / biases stay VMEM-resident across all grid steps.
            pl.BlockSpec((hidden, obs_dim), lambda i: (0, 0)),
            pl.BlockSpec((hidden, 1), lambda i: (0, 0)),
            pl.BlockSpec((act_dim, hidden), lambda i: (0, 0)),
            pl.BlockSpec((act_dim, 1), lambda i: (0, 0)),
        ],
        out_specs=pl.BlockSpec((act_dim, TB), lambda i: (0, i)),
        compiler_params=pltpu.CompilerParams(
            dimension_semantics=("parallel",),
            vmem_limit_bytes=48 << 20,
        ),
    )(state, w1t, b1t, w2t, b2t)

    mean = mean_t if feature_major_output else mean_t.T   # [B, act_dim] default
    # std is state independent: return a broadcastable row, never a B-sized
    # array of identical rows.
    std = jnp.exp(log_std).reshape(1, act_dim).astype(jnp.float32)
    return mean, std
    # TODO(synk): sample / log_prob / entropy are abstract Normal-distribution
    # ops on (mean, std); they are trivial elementwise JAX ops left to XLA.


def _reference_forward(state, w1, b1, w2, b2, log_std):
    h = jnp.tanh(state @ w1 + b1)
    mean = h @ w2 + b2
    std = jnp.exp(log_std).reshape(1, -1)
    return mean, std


if __name__ == "__main__":
    B, obs_dim, hidden, act_dim = 512, 32, 64, 8

    key = jax.random.PRNGKey(0)
    k_x, k_w1, k_w2 = jax.random.split(key, 3)

    state = jax.random.normal(k_x, (B, obs_dim), dtype=jnp.float32)
    w1 = jax.random.normal(k_w1, (obs_dim, hidden), jnp.float32) / jnp.sqrt(obs_dim)
    b1 = jnp.full((hidden,), 0.1, jnp.float32)
    w2 = jax.random.normal(k_w2, (hidden, act_dim), jnp.float32) / jnp.sqrt(hidden)
    b2 = jnp.full((act_dim,), -0.2, jnp.float32)
    log_std = jnp.full((act_dim,), -0.5, jnp.float32)

    ref_mean, ref_std = _reference_forward(state, w1, b1, w2, b2, log_std)

    # Default tile (grid=(2,) here because of the >=2-step cap), f32 path.
    mean, std = policy_forward(state, w1, b1, w2, b2, log_std)
    jax.block_until_ready((mean, std))
    assert mean.shape == (B, act_dim) and std.shape == (1, act_dim)
    assert jnp.allclose(mean, ref_mean, atol=1e-5, rtol=1e-5)
    assert jnp.allclose(std, ref_std, atol=1e-6, rtol=1e-6)

    # Small tile -> multi-step batch grid (grid=(4,) at TB=128).
    mean_s, _ = policy_forward(state, w1, b1, w2, b2, log_std, block_b=128)
    jax.block_until_ready(mean_s)
    assert jnp.allclose(mean_s, ref_mean, atol=1e-5, rtol=1e-5)

    # bf16 MXU path (state cast in-kernel, h cast before layer 2).
    mean_bf, std_bf = policy_forward(
        state, w1, b1, w2, b2, log_std, matmul_dtype=jnp.bfloat16
    )
    jax.block_until_ready((mean_bf, std_bf))
    assert jnp.allclose(mean_bf, ref_mean, atol=1e-1, rtol=1e-1)
    assert jnp.allclose(std_bf, ref_std, atol=1e-6, rtol=1e-6)

    # Ragged batch (exercises the partial-block read/write path, no padding).
    Br = 77
    mean_r, _ = policy_forward(state[:Br], w1, b1, w2, b2, log_std, block_b=128)
    jax.block_until_ready(mean_r)
    assert mean_r.shape == (Br, act_dim)
    assert jnp.allclose(mean_r, ref_mean[:Br], atol=1e-5, rtol=1e-5)

    # Feature-major output (skips the wrapper transpose for fused consumers).
    mean_fm, _ = policy_forward(
        state, w1, b1, w2, b2, log_std, feature_major_output=True
    )
    jax.block_until_ready(mean_fm)
    assert mean_fm.shape == (act_dim, B)
    assert jnp.allclose(mean_fm.T, ref_mean, atol=1e-5, rtol=1e-5)

    print("KERNEL_OK")
</pallas_src>

<mosaic_0001>
module attributes {stable_mosaic.version = 11 : i64} {
  func.func @_policy_mean_kernel(%arg0: i32, %arg1: memref<256x32xf32, #tpu.memory_space<vmem>>, %arg2: memref<64x32xf32, #tpu.memory_space<vmem>>, %arg3: memref<64x1xf32, #tpu.memory_space<vmem>>, %arg4: memref<8x64xf32, #tpu.memory_space<vmem>>, %arg5: memref<8x1xf32, #tpu.memory_space<vmem>>, %arg6: memref<8x256xf32, #tpu.memory_space<vmem>>) attributes {dimension_semantics = [#tpu.dimension_semantics<parallel>], iteration_bounds = array<i64: 2>, scalar_prefetch = 0 : i64, scratch_operands = 0 : i64, tpu.core_type = #tpu.core_type<tc>, window_params = [{transform_indices = @transform_0, window_bounds = array<i64: 256, 32>}, {pipeline_mode = #tpu.pipeline_mode<synchronous>, transform_indices = @transform_1, window_bounds = array<i64: 64, 32>}, {pipeline_mode = #tpu.pipeline_mode<synchronous>, transform_indices = @transform_2, window_bounds = array<i64: 64, 1>}, {pipeline_mode = #tpu.pipeline_mode<synchronous>, transform_indices = @transform_3, window_bounds = array<i64: 8, 64>}, {pipeline_mode = #tpu.pipeline_mode<synchronous>, transform_indices = @transform_4, window_bounds = array<i64: 8, 1>}, {transform_indices = @transform_5, window_bounds = array<i64: 8, 256>}]} {
    %c0 = arith.constant 0 : index
    %c0_0 = arith.constant 0 : index
    %0 = vector.load %arg1[%c0, %c0_0] : memref<256x32xf32, #tpu.memory_space<vmem>>, vector<256x32xf32>
    %c0_1 = arith.constant 0 : index
    %c0_2 = arith.constant 0 : index
    %1 = vector.load %arg2[%c0_1, %c0_2] : memref<64x32xf32, #tpu.memory_space<vmem>>, vector<64x32xf32>
    %cst = arith.constant dense<0.000000e+00> : vector<64x256xf32>
    %2 = tpu.matmul %1, %0, %cst {dimension_numbers = #tpu.dot_dimension_numbers<[1], [1], [0], [0], [0, 0, 1, 0], [], []>} : vector<64x32xf32>, vector<256x32xf32>, vector<64x256xf32> -> vector<64x256xf32>
    %c0_3 = arith.constant 0 : index
    %c0_4 = arith.constant 0 : index
    %3 = vector.load %arg3[%c0_3, %c0_4] : memref<64x1xf32, #tpu.memory_space<vmem>>, vector<64x1xf32>
    %4 = vector.broadcast %3 : vector<64x1xf32> to vector<64x256xf32>
    %5 = arith.addf %2, %4 : vector<64x256xf32>
    %6 = math.tanh %5 : vector<64x256xf32>
    %c0_5 = arith.constant 0 : index
    %c0_6 = arith.constant 0 : index
    %7 = vector.load %arg4[%c0_5, %c0_6] : memref<8x64xf32, #tpu.memory_space<vmem>>, vector<8x64xf32>
    %cst_7 = arith.constant dense<0.000000e+00> : vector<8x256xf32>
    %8 = tpu.matmul %7, %6, %cst_7 {dimension_numbers = #tpu.dot_dimension_numbers<[1], [0], [0], [1], [0, 0, 1, 1], [], []>} : vector<8x64xf32>, vector<64x256xf32>, vector<8x256xf32> -> vector<8x256xf32>
    %c0_8 = arith.constant 0 : index
    %c0_9 = arith.constant 0 : index
    %9 = vector.load %arg5[%c0_8, %c0_9] : memref<8x1xf32, #tpu.memory_space<vmem>>, vector<8x1xf32>
    %10 = vector.broadcast %9 : vector<8x1xf32> to vector<8x256xf32>
    %11 = arith.addf %8, %10 : vector<8x256xf32>
    %c0_10 = arith.constant 0 : index
    %c0_11 = arith.constant 0 : index
    %12 = vector.load %arg6[%c0_10, %c0_11] : memref<8x256xf32, #tpu.memory_space<vmem>>, vector<8x256xf32>
    tpu.vector_store %arg6[%c0_10, %c0_11], %11 {strides = array<i32>} : memref<8x256xf32, #tpu.memory_space<vmem>>, vector<8x256xf32>,
    return
  }
  func.func @transform_0(%arg0: i32) -> (i32, i32) {
    %c0_i32 = arith.constant 0 : i32
    %c0_i32_0 = arith.constant 0 : i32
    return %arg0, %c0_i32 : i32, i32
  }
  func.func @transform_1(%arg0: i32) -> (i32, i32) {
    %c0_i32 = arith.constant 0 : i32
    %c0_i32_0 = arith.constant 0 : i32
    %c0_i32_1 = arith.constant 0 : i32
    return %c0_i32, %c0_i32_0 : i32, i32
  }
  func.func @transform_2(%arg0: i32) -> (i32, i32) {
    %c0_i32 = arith.constant 0 : i32
    %c0_i32_0 = arith.constant 0 : i32
    %c0_i32_1 = arith.constant 0 : i32
    return %c0_i32, %c0_i32_0 : i32, i32
  }
  func.func @transform_3(%arg0: i32) -> (i32, i32) {
    %c0_i32 = arith.constant 0 : i32
    %c0_i32_0 = arith.constant 0 : i32
    %c0_i32_1 = arith.constant 0 : i32
    return %c0_i32, %c0_i32_0 : i32, i32
  }
  func.func @transform_4(%arg0: i32) -> (i32, i32) {
    %c0_i32 = arith.constant 0 : i32
    %c0_i32_0 = arith.constant 0 : i32
    %c0_i32_1 = arith.constant 0 : i32
    return %c0_i32, %c0_i32_0 : i32, i32
  }
  func.func @transform_5(%arg0: i32) -> (i32, i32) {
    %c0_i32 = arith.constant 0 : i32
    %c0_i32_0 = arith.constant 0 : i32
    return %c0_i32, %arg0 : i32, i32
  }
}

</mosaic_0001>

<bundles_post_ra>
// kernel: tpu_custom_call.1
= control target key start
LH: loop header
LB: loop body
LE: loop exit
PB: predicated region body
PF: predicated region fallthrough
CT: control target
= control target key end

     0   :  { %10 = vsyncpa [#allocation3], 0  ;;  %s1305_s0 = inlined_call_operand.vmem [shape: f32[512,32], index: 0, kind: input, shape index: {}]   ;;  %s1306_s1 = inlined_call_operand.vmem [shape: f32[64,32], index: 1, kind: input, shape index: {}]   ;;  %s1307_s2 = inlined_call_operand.vmem [shape: f32[64,1], index: 2, kind: input, shape index: {}]   ;;  %s1308_s3 = inlined_call_operand.vmem [shape: f32[8,64], index: 3, kind: input, shape index: {}]   ;;  %s1309_s4 = inlined_call_operand.vmem [shape: f32[8,1], index: 4, kind: input, shape index: {}]   ;;  %s1310_s5 = inlined_call_operand.hbm [shape: f32[8,512], index: 5, kind: output, shape index: {}]  }
   0x1   :  { %12 = vsyncpa [#allocation3 + $0x1], 0  ;;  %s1060_s18 = smov 0   ;;  %s1062_s19 = smov 0  }
   0x2   :  { %s1064_s20 = smov 0   ;;  %s1066_s21 = smov 0  }
   0x3 LB: > { %s1081_s22 = sadd.s32 4294967295, %s1025_s21   ;;  %s722_s23 = sadd.s32 4294967294, %s1025_s21   ;;  %s1025_s21 = sphi %s1066_s21, %s1318_s21   ;;  %s1021_s20 = sphi %s1064_s20, %s1317_s20   ;;  %s1017_s19 = sphi %s1062_s19, %s1316_s19   ;;  %s1013_s18 = sphi %s1060_s18, %s1315_s18  }
   0x4   : > { %s1085_s24 = sadd.s32 1, %s1025_s21   ;;  %s135_s25 = sadd.s32 1, %s1021_s20 }
   0x5   : > { %s132_s26 = ssub.s32 %s1025_s21, %s1085_s24  ;;  %p145_p0 = scmp.ne.s32.totalorder %s1021_s20, %s1017_s19 }
   0x6   : > { %p133_p1 = scmp.eq.s32.totalorder %s132_s26, 0  ;;  %p146_p2 = scmp.eq.s32.totalorder %s1081_s22, 1 }
   0x7   : > { %p151_p3 = scmp.ne.s32.totalorder %s1017_s19, %s1013_s18  ;;  %p152_p4 = scmp.eq.s32.totalorder %s722_s23, 1 }
   0x8   : > { %s1096_s27 = scalar_select %p133_p1, %s1021_s20, %s135_s25  }
   0x9   : > { %p1098_p5 = por %p146_p2, %p145_p0  ;;  %p1102_p6 = por %p152_p4, %p151_p3 }
   0xa   : > { %p725_p7 = scmp.ge.s32.totalorder %s1025_s21, 1  ;;  %p191_p8 = scmp.lt.s32.totalorder %s1025_s21, 3 }
   0xc   : > { %p192_p9 = pnand %p725_p7, %p191_p8 }
   0xd   : > { %s727_s30 = sshll.u32 (!%p192_p9), %s1081_s22, 5  ;;  %vm314_vm0 = vcmask (!%p192_p9), 261120   ;;  %v1112_v0 = vld [vmem:[%s1306_s1] sm:$0xff] (!%p192_p9)  ;;  %v1027_v1 = vmov (!%p192_p9), 0   ;;  %v268_v3 = vld [vmem:[%s1307_s2 + $0x10] sm:$0xff] (!%p192_p9)  ;;  %v267_v4 = vld [vmem:[%s1307_s2 + $0x8] sm:$0xff] (!%p192_p9) }
   0xe   : > { %195 = sbr.rel (%p192_p9) target bundleno = 580 (0x244), region = 40  ;;  %p220_p10 = scmp.lt.s32.totalorder (!%p192_p9), %s727_s30, 63  ;;  %808 = vmatprep.mubr.msk.f32.mxu0 (!%p192_p9), %vm314_vm0, %v1112_v0  ;;  %929 = vset.pattern.permute.xlu0 (!%p192_p9), %v1027_v1  ;;  %v266_v2 = vld [vmem:[%s1307_s2] sm:$0xff] (!%p192_p9)  ;;  %v269_v5 = vld [vmem:[%s1307_s2 + $0x18] sm:$0xff] (!%p192_p9)  ;;  %vm1135_vm1 = vmpackc.low (!%p192_p9), %vm314_vm0, %vm314_vm0  ;;  %vm571_vm2 = vcmask (!%p192_p9), 523264  }
   0xf   : > { %930 = vset.pattern.permute.xlu1 (!%p192_p9), %v1027_v1  ;;  %276 = vperm.xlu0 (!%p192_p9), %929, %v266_v2   ;;  %v270_v16 = vld [vmem:[%s1307_s2 + $0x20] sm:$0xff] (!%p192_p9)  ;;  %v271_v17 = vld [vmem:[%s1307_s2 + $0x28] sm:$0xff] (!%p192_p9)  ;;  %v272_v22 = vld [vmem:[%s1307_s2 + $0x30] sm:$0xff] (!%p192_p9)  ;;  %s216_s14 = sand.u32 (!%p192_p9), 1, %s1017_s19   ;;  %s775_s16 = sshll.u32 (!%p192_p9), %s1081_s22, 8 }
  0x10   : > { %286 = vperm.xlu1 (!%p192_p9), %930, %v268_v3   ;;  %v273_v23 = vld [vmem:[%s1307_s2 + $0x38] sm:$0xff] (!%p192_p9)  ;;  %v565_v26 = vld [vmem:[%s1309_s4] sm:$0xff] (!%p192_p9)  ;;  %v259_v60 = vld [vmem:[%s1306_s1 + $0x8] sm:$0xff] (!%p192_p9)  ;;  %v1028_v3 = vmov (!%p192_p9), 0.0   ;;  %s726_s15 = sshll.u32 (!%p192_p9), %s216_s14, 4  ;;  %s649_s22 = scalar_lea.sflag (!%p192_p9), [#allocation3], %s216_s14 }
  0x11   : > { %v260_v61 = vld [vmem:[%s1306_s1 + $0x10] sm:$0xff] (!%p192_p9)  ;;  %v261_v62 = vld [vmem:[%s1306_s1 + $0x18] sm:$0xff] (!%p192_p9)  ;;  %v262_v63 = vld [vmem:[%s1306_s1 + $0x20] sm:$0xff] (!%p192_p9)  ;;  %639 = vmatprep.mubr.f32.mxu1 (!%p192_p9), %v1028_v3  ;;  %s218_s17 = scalar_lea.vmem (!%p192_p9), [#allocation2], %s726_s15  ;;  %s1029_s7 = smov (!%p192_p9), [#allocation2]  }
  0x12   : > { %v264_v1 = vld [vmem:[%s1306_s1 + $0x30] sm:$0xff] (!%p192_p9)  ;;  %v265_v2 = vld [vmem:[%s1306_s1 + $0x38] sm:$0xff] (!%p192_p9)  ;;  %s663_s23 = sshll.u32 (!%p192_p9), %s218_s17, 4  ;;  %s967_s8 = sshll.u32 (!%p192_p9), %s1029_s7, 4  ;;  %s1265_s23 = int_to_ptr.vmem [resolvable:$true] %s663_s23  ;;  %s968_s8 = int_to_ptr.vmem [resolvable:$false] %s967_s8 }
  0x13   : > { %281 = vperm.xlu0 (!%p192_p9), %929, %v267_v4   ;;  %s963_s6 = scalar_lea.vmem (!%p192_p9), %s1265_s23, 256  ;;  %s969_s9 = scalar_lea.vmem (!%p192_p9), %s968_s8, 512 }
  0x14   : > { %291 = vperm.xlu1 (!%p192_p9), %930, %v269_v5   ;;  %p964_p11 = scmp.ne.s32.totalorder (!%p192_p9), %s1265_s23, %s963_s6  ;;  %p970_p0 = scmp.lt.s32.totalorder (!%p192_p9), %s1265_s23, %s968_s8 }
  0x15   : > { %s1320_s30 = smov (!%p220_p10, %s727_s30), 63  ;;  %p971_p1 = scmp.lt.s32.totalorder %s969_s9, %s963_s6 }
  0x16   : > { %s728_s12 = sshll.u32 %s1320_s30, 3  ;;  %s1263_s30 = scalar_lea.hbm %s1310_s5, %s775_s16 }
  0x17   : > { %s1131_s25 = scalar_lea.vmem %s1305_s0, %s728_s12  ;;  %296 = vperm.xlu0 %929, %v270_v16   ;;  %p965_p12 = pnand %p964_p11, %p1098_p5 }
  0x18   : > { %v242_v7 = vld [vmem:[%s1131_s25 + $0x80] sm:$0xff]  ;;  %v243_v8 = vld [vmem:[%s1131_s25 + $0x88] sm:$0xff]  ;;  %v244_v12 = vld [vmem:[%s1131_s25 + $0x90] sm:$0xff]  ;;  %301 = vperm.xlu1 %930, %v271_v17   ;;  %p972_p2 = por %p971_p1, %p970_p0 }
  0x19   : > { %v226_v9 = vld [vmem:[%s1131_s25] sm:$0xff]  ;;  %v824_v10 = vpack.c.bf16 %v243_v8, %v242_v7  ;;  %v227_v11 = vld [vmem:[%s1131_s25 + $0x8] sm:$0xff]  ;;  %v245_v13 = vld [vmem:[%s1131_s25 + $0x98] sm:$0xff]  ;;  %p966_p13 = pneg %p965_p12 }
  0x1a   : > { %v827_v14 = vpack.c.bf16 %v227_v11, %v226_v9  ;;  %v830_v15 = vpack.c.bf16 %v245_v13, %v244_v12  ;;  %v228_v18 = vld [vmem:[%s1131_s25 + $0x10] sm:$0xff]  ;;  %v229_v19 = vld [vmem:[%s1131_s25 + $0x18] sm:$0xff]  ;;  %v246_v20 = vld [vmem:[%s1131_s25 + $0xa0] sm:$0xff] }
  0x1b   : > { %826 = vmatprep.subr.msk.bf16.mxu0 %vm1135_vm1, %v824_v10  ;;  %v247_v21 = vld [vmem:[%s1131_s25 + $0xa8] sm:$0xff]  ;;  %v833_v24 = vpack.c.bf16 %v229_v19, %v228_v18  ;;  %306 = vperm.xlu0 %929, %v272_v22   ;;  %v230_v27 = vld [vmem:[%s1131_s25 + $0x20] sm:$0xff]  ;;  %v248_v29 = vld [vmem:[%s1131_s25 + $0xb0] sm:$0xff]  ;;  %p973_p3 = pnand %p972_p2, %p966_p13 }
  0x1c   : > { %829 = vmatpush3.bf16.xpose.msk.msra.mxu0 %vm1135_vm1, %v827_v14  ;;  %v836_v25 = vpack.c.bf16 %v247_v21, %v246_v20  ;;  %311 = vperm.xlu1 %930, %v273_v23   ;;  %v231_v28 = vld [vmem:[%s1131_s25 + $0x28] sm:$0xff]  ;;  %v249_v30 = vld [vmem:[%s1131_s25 + $0xb8] sm:$0xff]  ;;  %v232_v33 = vld [vmem:[%s1131_s25 + $0x30] sm:$0xff] }
  0x1d   : > { %832 = vmatprep.subr.msk.bf16.mxu0 %vm1135_vm1, %v830_v15  ;;  %v839_v31 = vpack.c.bf16 %v231_v28, %v230_v27  ;;  %v842_v32 = vpack.c.bf16 %v249_v30, %v248_v29  ;;  %v233_v34 = vld [vmem:[%s1131_s25 + $0x38] sm:$0xff]  ;;  %v250_v35 = vld [vmem:[%s1131_s25 + $0xc0] sm:$0xff]  ;;  %v251_v36 = vld [vmem:[%s1131_s25 + $0xc8] sm:$0xff] }
  0x1e   : > { %v845_v37 = vpack.c.bf16 %v233_v34, %v232_v33  ;;  %v848_v38 = vpack.c.bf16 %v251_v36, %v250_v35  ;;  %v234_v39 = vld [vmem:[%s1131_s25 + $0x40] sm:$0xff]  ;;  %v235_v40 = vld [vmem:[%s1131_s25 + $0x48] sm:$0xff]  ;;  %v252_v41 = vld [vmem:[%s1131_s25 + $0xd0] sm:$0xff] }
  0x1f   : > { %568 = vperm.xlu0 %929, %v565_v26   ;;  %v253_v42 = vld [vmem:[%s1131_s25 + $0xd8] sm:$0xff]  ;;  %v851_v43 = vpack.c.bf16 %v235_v40, %v234_v39  ;;  %v236_v45 = vld [vmem:[%s1131_s25 + $0x50] sm:$0xff]  ;;  %v254_v47 = vld [vmem:[%s1131_s25 + $0xe0] sm:$0xff] }
  0x20   : > { %v854_v44 = vpack.c.bf16 %v253_v42, %v252_v41  ;;  %v237_v46 = vld [vmem:[%s1131_s25 + $0x58] sm:$0xff]  ;;  %v255_v48 = vld [vmem:[%s1131_s25 + $0xe8] sm:$0xff]  ;;  %v238_v51 = vld [vmem:[%s1131_s25 + $0x60] sm:$0xff] }
  0x21   : > { %v857_v49 = vpack.c.bf16 %v237_v46, %v236_v45  ;;  %v860_v50 = vpack.c.bf16 %v255_v48, %v254_v47  ;;  %v239_v52 = vld [vmem:[%s1131_s25 + $0x68] sm:$0xff]  ;;  %v256_v53 = vld [vmem:[%s1131_s25 + $0xf0] sm:$0xff]  ;;  %v257_v54 = vld [vmem:[%s1131_s25 + $0xf8] sm:$0xff] }
  0x22   : > { %v863_v55 = vpack.c.bf16 %v239_v52, %v238_v51  ;;  %v866_v56 = vpack.c.bf16 %v257_v54, %v256_v53  ;;  %v240_v57 = vld [vmem:[%s1131_s25 + $0x70] sm:$0xff]  ;;  %v241_v58 = vld [vmem:[%s1131_s25 + $0x78] sm:$0xff] }
  0x23   : > { %v869_v59 = vpack.c.bf16 %v241_v58, %v240_v57 }
  0x24   : > { %835 = vmatpush3.bf16.xpose.msk.msra.mxu0 %vm1135_vm1, %v833_v24 }
  0x25   : > { %838 = vmatprep.subr.msk.bf16.mxu0 %vm1135_vm1, %v836_v25 }
  0x2c   : > { %841 = vmatpush3.bf16.xpose.msk.msra.mxu0 %vm1135_vm1, %v839_v31 }
  0x2d   : > { %844 = vmatprep.subr.msk.bf16.mxu0 %vm1135_vm1, %v842_v32 }
  0x34   : > { %847 = vmatpush3.bf16.xpose.msk.msra.mxu0 %vm1135_vm1, %v845_v37 }
  0x35   : > { %850 = vmatprep.subr.msk.bf16.mxu0 %vm1135_vm1, %v848_v38 }
  0x3c   : > { %853 = vmatpush3.bf16.xpose.msk.msra.mxu0 %vm1135_vm1, %v851_v43 }
  0x3d   : > { %856 = vmatprep.subr.msk.bf16.mxu0 %vm1135_vm1, %v854_v44 }
  0x44   : > { %859 = vmatpush3.bf16.xpose.msk.msra.mxu0 %vm1135_vm1, %v857_v49 }
  0x45   : > { %862 = vmatprep.subr.msk.bf16.mxu0 %vm1135_vm1, %v860_v50 }
  0x4c   : > { %865 = vmatpush3.bf16.xpose.msk.msra.mxu0 %vm1135_vm1, %v863_v55 }
  0x4d   : > { %868 = vmatprep.subr.msk.bf16.mxu0 %vm1135_vm1, %v866_v56 }
  0x54   : > { %871 = vmatpush3.bf16.xpose.msk.msra.mxu0 %vm1135_vm1, %v869_v59 }
  0x5b   : > { %809 = vmatmul.mubr.msk.f32.vlgmr.msra.gmra.mrb[0].mxu0 %vm314_vm0, %v1112_v0  ;;  %v263_v0 = vld [vmem:[%s1306_s1 + $0x28] sm:$0xff] }
  0x5c   : > { %810 = vmatprep.mubr.msk.f32.mxu0 %vm314_vm0, %v259_v60 }
  0x5f   : > { %811 = vmatmul.mubr.msk.f32.gmra.mrb[2].mxu0 %vm314_vm0, %v259_v60 }
  0x60   : > { %812 = vmatprep.mubr.msk.f32.mxu0 %vm314_vm0, %v260_v61 }
  0x63   : > { %813 = vmatmul.mubr.msk.f32.gmra.mrb[4].mxu0 %vm314_vm0, %v260_v61 }
  0x64   : > { %814 = vmatprep.mubr.msk.f32.mxu0 %vm314_vm0, %v261_v62 }
  0x67   : > { %815 = vmatmul.mubr.msk.f32.gmra.mrb[6].mxu0 %vm314_vm0, %v261_v62 }
  0x68   : > { %816 = vmatprep.mubr.msk.f32.mxu0 %vm314_vm0, %v262_v63 }
  0x6b   : > { %817 = vmatmul.mubr.msk.f32.gmra.mrb[8].mxu0 %vm314_vm0, %v262_v63 }
  0x6c   : > { %818 = vmatprep.mubr.msk.f32.mxu0 %vm314_vm0, %v263_v0 }
  0x6f   : > { %819 = vmatmul.mubr.msk.f32.gmra.mrb[10].mxu0 %vm314_vm0, %v263_v0 }
  0x70   : > { %820 = vmatprep.mubr.msk.f32.mxu0 %vm314_vm0, %v264_v1 }
  0x73   : > { %821 = vmatmul.mubr.msk.f32.gmra.mrb[12].mxu0 %vm314_vm0, %v264_v1 }
  0x74   : > { %822 = vmatprep.mubr.msk.f32.mxu0 %vm314_vm0, %v265_v2 }
  0x77   : > { %823 = vmatmul.mubr.msk.f32.gmra.mrb[14].mxu0 %vm314_vm0, %v265_v2 }
  0x8e   : > { %v277_v4 = vpop.permute.xlu0 %276 }
  0x8f   : > { %v287_v13 = vpop.permute.xlu1 %286 }
  0x92   : > { %v282_v9 = vpop.permute.xlu0 %281 }
  0x93   : > { %v292_v19 = vpop.permute.xlu1 %291 }
  0x96   : > { %v297_v26 = vpop.permute.xlu0 %296 }
  0x97   : > { %v302_v35 = vpop.permute.xlu1 %301 }
  0x9a   : > { %v307_v42 = vpop.permute.xlu0 %306 }
  0x9b   : > { %v312_v51 = vpop.permute.xlu1 %311 }
 0x12e   : > { %v501_v5 = vpop.f32.mrb[0].mxu0 }
 0x12f   : > { %v502_v6 = vadd.f32 %v501_v5, %v277_v4  ;;  %v503_v7 = vpop.f32.mrb[1].mxu0  ;;  %v569_v5 = vpop.permute.xlu0 %568 }
 0x130   : > { %v504_v8 = vadd.f32 %v503_v7, %v277_v4  ;;  %v564_v4 = vld [vmem:[%s1308_s3] sm:$0xff] }
 0x131   : > { %931 = vtanh.f32 %v502_v6 }
 0x132   : > { %v507_v10 = vpop.f32.mrb[2].mxu0  ;;  %933 = vtanh.f32 %v504_v8 }
 0x133   : > { %v508_v11 = vadd.f32 %v507_v10, %v282_v9  ;;  %v509_v12 = vpop.f32.mrb[3].mxu0 }
 0x134   : > { %v510_v14 = vadd.f32 %v509_v12, %v282_v9 }
 0x135   : > { %935 = vtanh.f32 %v508_v11 }
 0x136   : > { %937 = vtanh.f32 %v510_v14  ;;  %v513_v15 = vpop.f32.mrb[4].mxu0 }
 0x137   : > { %v514_v16 = vadd.f32 %v513_v15, %v287_v13  ;;  %v515_v17 = vpop.f32.mrb[5].mxu0 }
 0x138   : > { %v516_v18 = vadd.f32 %v515_v17, %v287_v13 }
 0x139   : > { %939 = vtanh.f32 %v514_v16 }
 0x13a   : > { %v519_v20 = vpop.f32.mrb[6].mxu0  ;;  %941 = vtanh.f32 %v516_v18 }
 0x13b   : > { %v520_v21 = vadd.f32 %v519_v20, %v292_v19  ;;  %v521_v22 = vpop.f32.mrb[7].mxu0  ;;  %v932_v24 = vpop.eup %931 }
 0x13c   : > { %v522_v23 = vadd.f32 %v521_v22, %v292_v19  ;;  %v934_v25 = vpop.eup %933 }
 0x13d   : > { %943 = vtanh.f32 %v520_v21 }
 0x13e   : > { %945 = vtanh.f32 %v522_v23  ;;  %v525_v27 = vpop.f32.mrb[8].mxu0 }
 0x13f   : > { %v936_v28 = vpop.eup %935  ;;  %v526_v29 = vadd.f32 %v525_v27, %v297_v26  ;;  %v527_v30 = vpop.f32.mrb[9].mxu0 }
 0x140   : > { %v938_v31 = vpop.eup %937  ;;  %v528_v32 = vadd.f32 %v527_v30, %v297_v26  ;;  %v874_v33 = vpack.c.bf16 %v936_v28, %v932_v24 }
 0x141   : > { %v872_v34 = vpack.c.bf16 %v938_v31, %v934_v25  ;;  %947 = vtanh.f32 %v526_v29 }
 0x142   : > { %v531_v36 = vpop.f32.mrb[10].mxu0  ;;  %949 = vtanh.f32 %v528_v32 }
 0x143   : > { %v532_v37 = vadd.f32 %v531_v36, %v302_v35  ;;  %v533_v38 = vpop.f32.mrb[11].mxu0  ;;  %873 = vmatprep.subr.bf16.mxu1 %v872_v34  ;;  %v940_v40 = vpop.eup %939 }
 0x144   : > { %v534_v39 = vadd.f32 %v533_v38, %v302_v35  ;;  %875 = vmatpush1.bf16.msra.mxu1 %v874_v33  ;;  %v942_v41 = vpop.eup %941 }
 0x145   : > { %951 = vtanh.f32 %v532_v37 }
 0x146   : > { %953 = vtanh.f32 %v534_v39  ;;  %v537_v43 = vpop.f32.mrb[12].mxu0 }
 0x147   : > { %v944_v44 = vpop.eup %943  ;;  %v538_v45 = vadd.f32 %v537_v43, %v307_v42  ;;  %v539_v46 = vpop.f32.mrb[13].mxu0 }
 0x148   : > { %v946_v47 = vpop.eup %945  ;;  %v540_v48 = vadd.f32 %v539_v46, %v307_v42  ;;  %v878_v49 = vpack.c.bf16 %v944_v44, %v940_v40 }
 0x149   : > { %v876_v50 = vpack.c.bf16 %v946_v47, %v942_v41  ;;  %955 = vtanh.f32 %v538_v45 }
 0x14a   : > { %v543_v52 = vpop.f32.mrb[14].mxu0  ;;  %957 = vtanh.f32 %v540_v48 }
 0x14b   : > { %v544_v53 = vadd.f32 %v543_v52, %v312_v51  ;;  %v545_v54 = vpop.f32.mrb[15].mxu0  ;;  %877 = vmatprep.subr.bf16.mxu1 %v876_v50  ;;  %v948_v56 = vpop.eup %947 }
 0x14c   : > { %v546_v55 = vadd.f32 %v545_v54, %v312_v51  ;;  %879 = vmatpush1.bf16.msra.mxu1 %v878_v49  ;;  %v950_v57 = vpop.eup %949 }
 0x14d   : > { %959 = vtanh.f32 %v544_v53 }
 0x14e   : > { %961 = vtanh.f32 %v546_v55 }
 0x14f   : > { %v952_v58 = vpop.eup %951 }
 0x150   : > { %v954_v59 = vpop.eup %953  ;;  %v882_v60 = vpack.c.bf16 %v952_v58, %v948_v56 }
 0x151   : > { %v880_v61 = vpack.c.bf16 %v954_v59, %v950_v57 }
 0x153   : > { %881 = vmatprep.subr.bf16.mxu1 %v880_v61  ;;  %v956_v62 = vpop.eup %955 }
 0x154   : > { %883 = vmatpush1.bf16.msra.mxu1 %v882_v60  ;;  %v958_v63 = vpop.eup %957 }
 0x157   : > { %v960_v0 = vpop.eup %959 }
 0x158   : > { %v962_v1 = vpop.eup %961  ;;  %v886_v2 = vpack.c.bf16 %v960_v0, %v956_v62 }
 0x159   : > { %v884_v3 = vpack.c.bf16 %v962_v1, %v958_v63 }
 0x15b   : > { %885 = vmatprep.subr.bf16.mxu1 %v884_v3 }
 0x15c   : > { %887 = vmatpush1.bf16.msra.mxu1 %v886_v2 }
 0x15f   : > { %769 = vmatmul.mubr.msk.f32.vlgmr.msra.gmra.mrb[0].mxu1 %vm571_vm2, %v564_v4 }
 0x232   : > { %v641_v6 = vpop.f32.mrb[0].mxu1 }
 0x233   : > { %v642_v7 = vadd.f32 %v641_v6, %v569_v5  ;;  %v643_v8 = vpop.f32.mrb[1].mxu1 }
 0x234   : > { %v644_v9 = vadd.f32 %v643_v8, %v569_v5 }
 0x235   : > { %646 = vst [vmem:[%s218_s17] sm:$0xff] %v642_v7 }
 0x236   : > { %647 = vst [vmem:[%s218_s17 + $0x8] sm:$0xff] %v644_v9 }
 0x237   : > { %976 = shalt.err (!%p973_p3)
}
 0x238   : > { %s977_s10 = scalar_lea.hbm %s1263_s30, 256  ;;  %s981_s13 = scalar_lea.hbm %s1310_s5, 512 }
 0x239   : > { %p978_p4 = scmp.ne.s32.totalorder %s1263_s30, %s977_s10  ;;  %p982_p9 = scmp.lt.u32.totalorder %s1263_s30, %s1310_s5 }
 0x23a   : > { %p983_p10 = scmp.lt.u32.totalorder %s981_s13, %s977_s10  ;;  %p985_p12 = scmp.lt.u32.totalorder %s977_s10, %s1263_s30 }
 0x23b   : > { %p979_p7 = pnand %p978_p4, %p1098_p5 }
 0x23c   : > { %p984_p11 = por %p983_p10, %p982_p9 }
 0x23d   : > { %p980_p8 = pneg %p979_p7 }
 0x23e   : > { %p986_p13 = por %p985_p12, %p984_p11 }
 0x240   : > { %p987_p0 = pnand %p986_p13, %p980_p8 }
 0x242   : > { %990 = shalt.err (!%p987_p0)
}
 0x243   : > { %888 = dma.vmem_to_hbm [thread:$0]  (%p1098_p5), %s1265_s23, 256, %s1263_s30, %s649_s22  }
 0x244 PF: > { %p894_p1 = scmp.ge.s32.totalorder %s1025_s21, 2  ;;  %s675_s16 = sand.u32 1, %s1013_s18  }
 0x245   : > { %s676_s17 = scalar_lea.sflag [#allocation3], %s675_s16 }
 0x246   : > { %p891_p2 = pnand %p894_p1, %p1102_p6 }
 0x248   : > { %1008 = dma.done.wait (!%p891_p2), %s676_s17, 256  }
 0x249   : > { %1010 = vsyncadd (!%p891_p2), %s676_s17, 4294967040  ;;  %p15_p3 = scmp.ge.s32.totalorder %s1085_s24, 4   ;;  %s1315_s18 = smov %s1017_s19 }
 0x24a   : > { %s1316_s19 = smov %s1021_s20  ;;  %s1317_s20 = smov %s1096_s27 }
 0x24b   : > { %s1318_s21 = smov %s1085_s24  ;;  %17 = sbr.rel (!%p15_p3) target bundleno = 3 (0x3), region = 75 }
 0x252   :  { %681 = vsyncpa [#allocation3], 1 }
 0x253   :  { %683 = vsyncpa [#allocation3 + $0x1], 1 }

</bundles_post_ra>
